<compile_context>
chip_gen: v7x
topology: tpu7x:2x2x1
jax: 0.10.0
libtpu: 0.0.40
codegen_flags: <defaults>
</compile_context>

<pallas_src>
import functools

import jax
import jax.numpy as jnp
from jax.experimental import pallas as pl
from jax.experimental.pallas import tpu as pltpu

# Representative gin configuration of the module.
D_IN, HID, D_OUT = 32, 64, 16
FOLD = 128 // D_OUT          # 8 batch rows folded onto the 128-lane axis
QUANTUM = 8 * FOLD           # 64 batch rows per (8, 128) output tile
COMPUTE_DTYPE = jnp.bfloat16


def _round_up(n, m):
    return ((n + m - 1) // m) * m


def _cdiv(a, b):
    return (a + b - 1) // b


# ---------------------------------------------------------------------------
# Pallas kernel: fused 3-layer MLP on batch-folded, lane-dense operands.
#
# Folded layout: folded row g holds batch rows 8g..8g+7; batch-offset k lives
# in lanes [32k, 32k+32) of x, [64k, 64k+64) of the hidden activations and
# [16k, 16k+16) of the output.
#
#   x_ref : (rows, 256)  f32 (cast to bf16 in-kernel)
#   w1_ref: (128, 256)   bf16  kron(eye(4), W1)   (block-diagonal)
#   w2_ref: (128, 128)   bf16  kron(eye(2), W2)
#   w3_ref: (512, 128)   bf16  kron(eye(8), W3)
#   b1_ref: (1, 256) f32,  b2_ref/b3_ref: (1, 128) f32
#   o_ref : (rows, 128)  out_dtype (lane-dense output slab)
#
# The 128-lane slicing of x and h1 skips the all-zero off-diagonal tiles of the
# naive kron(eye(8), .) weights: 12 MXU weight-tile pushes per 8 folded rows
# instead of 28, while every slice stays on a 128-lane vreg boundary (no
# relayout).  Mathematically identical to the per-row MLP.
# ---------------------------------------------------------------------------
def _mlp_kernel(x_ref, w1_ref, b1_ref, w2_ref, b2_ref, w3_ref, b3_ref, o_ref):
    x = x_ref[...].astype(COMPUTE_DTYPE)      # f32->bf16 cast fused into the kernel
    w1 = w1_ref[...]
    w2 = w2_ref[...]
    w3 = w3_ref[...]
    b1 = b1_ref[...]
    b2 = b2_ref[...]
    b3 = b3_ref[...]

    h2_parts = []
    for s in range(2):                        # 128-lane slice of x: offsets 4s..4s+3
        xs = x[:, s * 128:(s + 1) * 128]
        h1 = jnp.dot(xs, w1, preferred_element_type=jnp.float32)
        h1 = jnp.maximum(h1 + b1, 0.0).astype(COMPUTE_DTYPE)      # (rows, 256)
        for t in range(2):                    # 128-lane slice of h1: offsets 4s+2t, 4s+2t+1
            hs = h1[:, t * 128:(t + 1) * 128]
            h2 = jnp.dot(hs, w2, preferred_element_type=jnp.float32)
            h2_parts.append(jnp.maximum(h2 + b2, 0.0).astype(COMPUTE_DTYPE))
    # Lane-concat at 128-lane boundaries is layout-preserving (no relayout);
    # the pieces are in batch-offset order 0..7.
    h2 = jnp.concatenate(h2_parts, axis=1)                         # (rows, 512) bf16
    y = jnp.dot(h2, w3, preferred_element_type=jnp.float32) + b3
    o_ref[...] = y.astype(o_ref.dtype)


# ---------------------------------------------------------------------------
# One-time parameter folding (keep the result around; do NOT re-fold per call).
# ---------------------------------------------------------------------------
def fold_params(params, compute_dtype=COMPUTE_DTYPE):
    """Precompute the block-diagonal weights / lane-tiled biases once."""
    (w1, b1), (w2, b2), (w3, b3) = params
    assert w1.shape == (D_IN, HID) and w2.shape == (HID, HID) and w3.shape == (HID, D_OUT), (
        "kernel is specialized to Linear(32,64)-ReLU-Linear(64,64)-ReLU-Linear(64,16)")
    # TODO(synk): other gin-configured layer stacks (different widths, non-Linear
    # layers) are not handled by this specialized kernel.

    def kron_w(w, n):
        return jnp.kron(jnp.eye(n, dtype=w.dtype), w).astype(compute_dtype)

    w1s = kron_w(w1, 4)                        # (128, 256)
    w2s = kron_w(w2, 2)                        # (128, 128)
    w3s = kron_w(w3, FOLD)                     # (512, 128)
    b1f = jnp.tile(b1.astype(jnp.float32), 4).reshape(1, 4 * HID)       # (1, 256)
    b2f = jnp.tile(b2.astype(jnp.float32), 2).reshape(1, 2 * HID)       # (1, 128)
    b3f = jnp.tile(b3.astype(jnp.float32), FOLD).reshape(1, FOLD * D_OUT)  # (1, 128)
    return (w1s, b1f, w2s, b2f, w3s, b3f)


# ---------------------------------------------------------------------------
# Tiling helpers.
# ---------------------------------------------------------------------------
def _choose_rows_tile(total_rows, rows_target):
    """Pick the folded-row tile size (multiple of 8).

    Prefers (a) >= 4 grid tiles when the batch allows (both v7x TensorCores get
    >= 2 steps of prefetch overlap) and (b) a tile size that divides the batch
    exactly, so the wrapper never pays a jnp.pad copy of x on large batches.
    """
    rows_target = max(8, (rows_target // 8) * 8)
    rows_target = min(rows_target, _round_up(total_rows, 8))
    if total_rows >= 4 * 8:
        rows_target = min(rows_target, _round_up(_cdiv(total_rows, 4), 8))
    for cand in range(rows_target, max(8, rows_target // 2) - 1, -8):
        if total_rows % cand == 0:
            return cand
    return rows_target


def _vmem_limit_bytes():
    cap = None
    try:
        cap = getattr(pltpu.get_tpu_info(), "vmem_capacity_bytes", None)
    except Exception:
        cap = None
    if not cap:
        return 32 * 1024 * 1024            # safe everywhere (v7x has 64 MiB physical VMEM)
    return int(min(64 * 1024 * 1024, cap * 3 // 4))


# ---------------------------------------------------------------------------
# Wrapper.
# ---------------------------------------------------------------------------
def sequential_forward(x, folded_params, *, tm=8192, out_dtype=jnp.float32):
    """Fused forward of Linear(32,64)-ReLU-Linear(64,64)-ReLU-Linear(64,16).

    x: [B, 32].  folded_params: output of fold_params() (weights stored [in, out],
    so y = x @ W + b, equivalent to torch's x @ W.T + b).
    tm: target batch rows per grid tile; 8192-16384 amortizes the ~0.35us fixed
    per-grid-step overhead while keeping the per-tile VMEM working set small.
    """
    w1s, b1f, w2s, b2f, w3s, b3f = folded_params
    B, d_in = x.shape
    assert d_in == D_IN, f"kernel specialized to d_in={D_IN}, got {d_in}"

    # Batch tiling over folded rows (1 folded row = 8 batch rows on the lane axis).
    b_quant = _round_up(B, QUANTUM)
    total_rows = b_quant // FOLD
    rows_tile = _choose_rows_tile(total_rows, max(QUANTUM, int(tm)) // FOLD)
    n_tiles = _cdiv(total_rows, rows_tile)
    rows_pad = n_tiles * rows_tile
    b_pad = rows_pad * FOLD

    # Fold 8 consecutive batch rows onto the lane axis.  No dtype cast here (it
    # is fused into the kernel); padding (an extra copy of x) only happens when
    # B is not a multiple of 64 or no dividing tile size exists.
    # TODO(synk): a huge batch that is not a multiple of 64 still pays one
    # jnp.pad copy; a small second pallas_call for the remainder would avoid it.
    xp = x if b_pad == B else jnp.pad(x, ((0, b_pad - B), (0, 0)))
    x_f = xp.reshape(rows_pad, FOLD * D_IN)

    # Weights/biases are tiny (~0.23 MiB total) with constant index maps, so they
    # stay resident; default double-buffering on them costs < 0.5 MiB of VMEM,
    # which is negligible headroom-wise.
    def resident(shape):
        return pl.BlockSpec(shape, lambda i: (0, 0))

    out_f = pl.pallas_call(
        _mlp_kernel,
        out_shape=jax.ShapeDtypeStruct((rows_pad, FOLD * D_OUT), out_dtype),
        grid=(n_tiles,),
        in_specs=[
            pl.BlockSpec((rows_tile, FOLD * D_IN), lambda i: (i, 0)),   # streamed x tile
            resident(w1s.shape), resident(b1f.shape),
            resident(w2s.shape), resident(b2f.shape),
            resident(w3s.shape), resident(b3f.shape),
        ],
        out_specs=pl.BlockSpec((rows_tile, FOLD * D_OUT), lambda i: (i, 0)),
        compiler_params=pltpu.CompilerParams(
            dimension_semantics=("parallel",),
            vmem_limit_bytes=_vmem_limit_bytes(),
        ),
    )(x_f, w1s, b1f, w2s, b2f, w3s, b3f)

    y = out_f.reshape(b_pad, D_OUT)
    return y[:B] if b_pad != B else y


# ---------------------------------------------------------------------------
# Parameter init matching the PyTorch module's init():
#   xavier_normal_ on Linear weights, bias filled with 0.
# ---------------------------------------------------------------------------
def xavier_normal(key, fan_in, fan_out, dtype=jnp.float32):
    std = (2.0 / (fan_in + fan_out)) ** 0.5
    return std * jax.random.normal(key, (fan_in, fan_out), dtype=dtype)


def make_params(key, dims):
    params = []
    for i in range(len(dims) - 1):
        key, sub = jax.random.split(key)
        w = xavier_normal(sub, dims[i], dims[i + 1])
        b = jnp.zeros((dims[i + 1],), jnp.float32)
        params.append((w, b))
    return params


# Plain-JAX reference.  compute_dtype=jnp.bfloat16 mirrors the kernel's operand
# quantization (bf16 MXU operands and bf16 hidden activations, f32 accumulate /
# bias / ReLU) — an intentional accuracy trade vs. the full-f32 PyTorch module.
def reference_forward(x, params, compute_dtype=jnp.float32):
    h = x
    last = len(params) - 1
    for i, (w, b) in enumerate(params):
        h = jnp.dot(h.astype(compute_dtype), w.astype(compute_dtype),
                    preferred_element_type=jnp.float32) + b
        if i != last:
            h = jnp.maximum(h, 0.0)
    return h


if __name__ == "__main__":
    key = jax.random.PRNGKey(0)
    k_x, k_p = jax.random.split(key)

    B = 8
    x = jax.random.normal(k_x, (B, D_IN), dtype=jnp.float32)
    params = make_params(k_p, [D_IN, HID, HID, D_OUT])

    # Fold the weights once, outside the per-call hot path.
    folded = jax.tree_util.tree_map(jax.block_until_ready, fold_params(params))

    run = jax.jit(functools.partial(sequential_forward, tm=8192))
    y = jax.block_until_ready(run(x, folded))

    y_bf16_ref = reference_forward(x, params, compute_dtype=jnp.bfloat16)
    y_f32_ref = reference_forward(x, params, compute_dtype=jnp.float32)

    assert y.shape == (B, D_OUT)
    assert y.dtype == jnp.float32
    # Tight check vs. a reference using the same bf16 operand/activation quantization.
    assert jnp.allclose(y, y_bf16_ref, atol=1e-2, rtol=1e-2), \
        float(jnp.max(jnp.abs(y - y_bf16_ref)))
    # Loose sanity check vs. the full-f32 reference (bf16 quantization noise only).
    assert jnp.allclose(y, y_f32_ref, atol=1e-1, rtol=1e-1), \
        float(jnp.max(jnp.abs(y - y_f32_ref)))

    print("KERNEL_OK")
</pallas_src>

<mosaic_0001>
module attributes {stable_mosaic.version = 11 : i64} {
  func.func @_mlp_kernel(%arg0: i32, %arg1: memref<8x256xf32, #tpu.memory_space<vmem>>, %arg2: memref<128x256xbf16, #tpu.memory_space<vmem>>, %arg3: memref<1x256xf32, #tpu.memory_space<vmem>>, %arg4: memref<128x128xbf16, #tpu.memory_space<vmem>>, %arg5: memref<1x128xf32, #tpu.memory_space<vmem>>, %arg6: memref<512x128xbf16, #tpu.memory_space<vmem>>, %arg7: memref<1x128xf32, #tpu.memory_space<vmem>>, %arg8: memref<8x128xf32, #tpu.memory_space<vmem>>) attributes {dimension_semantics = [#tpu.dimension_semantics<parallel>], iteration_bounds = array<i64: 1>, scalar_prefetch = 0 : i64, scratch_operands = 0 : i64, tpu.core_type = #tpu.core_type<tc>, window_params = [{transform_indices = @transform_0, window_bounds = array<i64: 8, 256>}, {pipeline_mode = #tpu.pipeline_mode<synchronous>, transform_indices = @transform_1, window_bounds = array<i64: 128, 256>}, {pipeline_mode = #tpu.pipeline_mode<synchronous>, transform_indices = @transform_2, window_bounds = array<i64: 1, 256>}, {pipeline_mode = #tpu.pipeline_mode<synchronous>, transform_indices = @transform_3, window_bounds = array<i64: 128, 128>}, {pipeline_mode = #tpu.pipeline_mode<synchronous>, transform_indices = @transform_4, window_bounds = array<i64: 1, 128>}, {pipeline_mode = #tpu.pipeline_mode<synchronous>, transform_indices = @transform_5, window_bounds = array<i64: 512, 128>}, {pipeline_mode = #tpu.pipeline_mode<synchronous>, transform_indices = @transform_6, window_bounds = array<i64: 1, 128>}, {transform_indices = @transform_7, window_bounds = array<i64: 8, 128>}]} {
    %c0 = arith.constant 0 : index
    %c0_0 = arith.constant 0 : index
    %0 = vector.load %arg1[%c0, %c0_0] : memref<8x256xf32, #tpu.memory_space<vmem>>, vector<8x256xf32>
    %1 = arith.truncf %0 : vector<8x256xf32> to vector<8x256xbf16>
    %c0_1 = arith.constant 0 : index
    %c0_2 = arith.constant 0 : index
    %2 = vector.load %arg2[%c0_1, %c0_2] : memref<128x256xbf16, #tpu.memory_space<vmem>>, vector<128x256xbf16>
    %c0_3 = arith.constant 0 : index
    %c0_4 = arith.constant 0 : index
    %3 = vector.load %arg4[%c0_3, %c0_4] : memref<128x128xbf16, #tpu.memory_space<vmem>>, vector<128x128xbf16>
    %c0_5 = arith.constant 0 : index
    %c0_6 = arith.constant 0 : index
    %4 = vector.load %arg6[%c0_5, %c0_6] : memref<512x128xbf16, #tpu.memory_space<vmem>>, vector<512x128xbf16>
    %c0_7 = arith.constant 0 : index
    %c0_8 = arith.constant 0 : index
    %5 = vector.load %arg3[%c0_7, %c0_8] : memref<1x256xf32, #tpu.memory_space<vmem>>, vector<1x256xf32>
    %c0_9 = arith.constant 0 : index
    %c0_10 = arith.constant 0 : index
    %6 = vector.load %arg5[%c0_9, %c0_10] : memref<1x128xf32, #tpu.memory_space<vmem>>, vector<1x128xf32>
    %c0_11 = arith.constant 0 : index
    %c0_12 = arith.constant 0 : index
    %7 = vector.load %arg7[%c0_11, %c0_12] : memref<1x128xf32, #tpu.memory_space<vmem>>, vector<1x128xf32>
    %8 = vector.extract_strided_slice %1 {offsets = [0, 0], sizes = [8, 128], strides = [1, 1]} : vector<8x256xbf16> to vector<8x128xbf16>
    %cst = arith.constant dense<0.000000e+00> : vector<8x256xf32>
    %9 = tpu.matmul %8, %2, %cst {dimension_numbers = #tpu.dot_dimension_numbers<[1], [0], [0], [1], [0, 0, 1, 1], [], []>} : vector<8x128xbf16>, vector<128x256xbf16>, vector<8x256xf32> -> vector<8x256xf32>
    %10 = vector.broadcast %5 : vector<1x256xf32> to vector<8x256xf32>
    %11 = arith.addf %9, %10 : vector<8x256xf32>
    %cst_13 = arith.constant 0.000000e+00 : f32
    %12 = vector.broadcast %cst_13 : f32 to vector<8x256xf32>
    %13 = arith.maximumf %11, %12 : vector<8x256xf32>
    %14 = arith.truncf %13 : vector<8x256xf32> to vector<8x256xbf16>
    %15 = vector.extract_strided_slice %14 {offsets = [0, 0], sizes = [8, 128], strides = [1, 1]} : vector<8x256xbf16> to vector<8x128xbf16>
    %cst_14 = arith.constant dense<0.000000e+00> : vector<8x128xf32>
    %16 = tpu.matmul %15, %3, %cst_14 {dimension_numbers = #tpu.dot_dimension_numbers<[1], [0], [0], [1], [0, 0, 1, 1], [], []>} : vector<8x128xbf16>, vector<128x128xbf16>, vector<8x128xf32> -> vector<8x128xf32>
    %17 = vector.broadcast %6 : vector<1x128xf32> to vector<8x128xf32>
    %18 = arith.addf %16, %17 : vector<8x128xf32>
    %cst_15 = arith.constant 0.000000e+00 : f32
    %19 = vector.broadcast %cst_15 : f32 to vector<8x128xf32>
    %20 = arith.maximumf %18, %19 : vector<8x128xf32>
    %21 = arith.truncf %20 : vector<8x128xf32> to vector<8x128xbf16>
    %22 = vector.extract_strided_slice %14 {offsets = [0, 128], sizes = [8, 128], strides = [1, 1]} : vector<8x256xbf16> to vector<8x128xbf16>
    %cst_16 = arith.constant dense<0.000000e+00> : vector<8x128xf32>
    %23 = tpu.matmul %22, %3, %cst_16 {dimension_numbers = #tpu.dot_dimension_numbers<[1], [0], [0], [1], [0, 0, 1, 1], [], []>} : vector<8x128xbf16>, vector<128x128xbf16>, vector<8x128xf32> -> vector<8x128xf32>
    %24 = vector.broadcast %6 : vector<1x128xf32> to vector<8x128xf32>
    %25 = arith.addf %23, %24 : vector<8x128xf32>
    %cst_17 = arith.constant 0.000000e+00 : f32
    %26 = vector.broadcast %cst_17 : f32 to vector<8x128xf32>
    %27 = arith.maximumf %25, %26 : vector<8x128xf32>
    %28 = arith.truncf %27 : vector<8x128xf32> to vector<8x128xbf16>
    %29 = vector.extract_strided_slice %1 {offsets = [0, 128], sizes = [8, 128], strides = [1, 1]} : vector<8x256xbf16> to vector<8x128xbf16>
    %cst_18 = arith.constant dense<0.000000e+00> : vector<8x256xf32>
    %30 = tpu.matmul %29, %2, %cst_18 {dimension_numbers = #tpu.dot_dimension_numbers<[1], [0], [0], [1], [0, 0, 1, 1], [], []>} : vector<8x128xbf16>, vector<128x256xbf16>, vector<8x256xf32> -> vector<8x256xf32>
    %31 = vector.broadcast %5 : vector<1x256xf32> to vector<8x256xf32>
    %32 = arith.addf %30, %31 : vector<8x256xf32>
    %cst_19 = arith.constant 0.000000e+00 : f32
    %33 = vector.broadcast %cst_19 : f32 to vector<8x256xf32>
    %34 = arith.maximumf %32, %33 : vector<8x256xf32>
    %35 = arith.truncf %34 : vector<8x256xf32> to vector<8x256xbf16>
    %36 = vector.extract_strided_slice %35 {offsets = [0, 0], sizes = [8, 128], strides = [1, 1]} : vector<8x256xbf16> to vector<8x128xbf16>
    %cst_20 = arith.constant dense<0.000000e+00> : vector<8x128xf32>
    %37 = tpu.matmul %36, %3, %cst_20 {dimension_numbers = #tpu.dot_dimension_numbers<[1], [0], [0], [1], [0, 0, 1, 1], [], []>} : vector<8x128xbf16>, vector<128x128xbf16>, vector<8x128xf32> -> vector<8x128xf32>
    %38 = vector.broadcast %6 : vector<1x128xf32> to vector<8x128xf32>
    %39 = arith.addf %37, %38 : vector<8x128xf32>
    %cst_21 = arith.constant 0.000000e+00 : f32
    %40 = vector.broadcast %cst_21 : f32 to vector<8x128xf32>
    %41 = arith.maximumf %39, %40 : vector<8x128xf32>
    %42 = arith.truncf %41 : vector<8x128xf32> to vector<8x128xbf16>
    %43 = vector.extract_strided_slice %35 {offsets = [0, 128], sizes = [8, 128], strides = [1, 1]} : vector<8x256xbf16> to vector<8x128xbf16>
    %cst_22 = arith.constant dense<0.000000e+00> : vector<8x128xf32>
    %44 = tpu.matmul %43, %3, %cst_22 {dimension_numbers = #tpu.dot_dimension_numbers<[1], [0], [0], [1], [0, 0, 1, 1], [], []>} : vector<8x128xbf16>, vector<128x128xbf16>, vector<8x128xf32> -> vector<8x128xf32>
    %45 = vector.broadcast %6 : vector<1x128xf32> to vector<8x128xf32>
    %46 = arith.addf %44, %45 : vector<8x128xf32>
    %cst_23 = arith.constant 0.000000e+00 : f32
    %47 = vector.broadcast %cst_23 : f32 to vector<8x128xf32>
    %48 = arith.maximumf %46, %47 : vector<8x128xf32>
    %49 = arith.truncf %48 : vector<8x128xf32> to vector<8x128xbf16>
    %50 = tpu.concatenate %21, %28, %42, %49 in 1 : vector<8x128xbf16>, vector<8x128xbf16>, vector<8x128xbf16>, vector<8x128xbf16> -> vector<8x512xbf16>
    %cst_24 = arith.constant dense<0.000000e+00> : vector<8x128xf32>
    %51 = tpu.matmul %50, %4, %cst_24 {dimension_numbers = #tpu.dot_dimension_numbers<[1], [0], [0], [1], [0, 0, 1, 1], [], []>} : vector<8x512xbf16>, vector<512x128xbf16>, vector<8x128xf32> -> vector<8x128xf32>
    %52 = vector.broadcast %7 : vector<1x128xf32> to vector<8x128xf32>
    %53 = arith.addf %51, %52 : vector<8x128xf32>
    %c0_25 = arith.constant 0 : index
    %c0_26 = arith.constant 0 : index
    %54 = vector.load %arg8[%c0_25, %c0_26] : memref<8x128xf32, #tpu.memory_space<vmem>>, vector<8x128xf32>
    tpu.vector_store %arg8[%c0_25, %c0_26], %53 {strides = array<i32>} : memref<8x128xf32, #tpu.memory_space<vmem>>, vector<8x128xf32>,
    return
  }
  func.func @transform_0(%arg0: i32) -> (i32, i32) {
    %c0_i32 = arith.constant 0 : i32
    %c0_i32_0 = arith.constant 0 : i32
    return %arg0, %c0_i32 : i32, i32
  }
  func.func @transform_1(%arg0: i32) -> (i32, i32) {
    %c0_i32 = arith.constant 0 : i32
    %c0_i32_0 = arith.constant 0 : i32
    %c0_i32_1 = arith.constant 0 : i32
    return %c0_i32, %c0_i32_0 : i32, i32
  }
  func.func @transform_2(%arg0: i32) -> (i32, i32) {
    %c0_i32 = arith.constant 0 : i32
    %c0_i32_0 = arith.constant 0 : i32
    %c0_i32_1 = arith.constant 0 : i32
    return %c0_i32, %c0_i32_0 : i32, i32
  }
  func.func @transform_3(%arg0: i32) -> (i32, i32) {
    %c0_i32 = arith.constant 0 : i32
    %c0_i32_0 = arith.constant 0 : i32
    %c0_i32_1 = arith.constant 0 : i32
    return %c0_i32, %c0_i32_0 : i32, i32
  }
  func.func @transform_4(%arg0: i32) -> (i32, i32) {
    %c0_i32 = arith.constant 0 : i32
    %c0_i32_0 = arith.constant 0 : i32
    %c0_i32_1 = arith.constant 0 : i32
    return %c0_i32, %c0_i32_0 : i32, i32
  }
  func.func @transform_5(%arg0: i32) -> (i32, i32) {
    %c0_i32 = arith.constant 0 : i32
    %c0_i32_0 = arith.constant 0 : i32
    %c0_i32_1 = arith.constant 0 : i32
    return %c0_i32, %c0_i32_0 : i32, i32
  }
  func.func @transform_6(%arg0: i32) -> (i32, i32) {
    %c0_i32 = arith.constant 0 : i32
    %c0_i32_0 = arith.constant 0 : i32
    %c0_i32_1 = arith.constant 0 : i32
    return %c0_i32, %c0_i32_0 : i32, i32
  }
  func.func @transform_7(%arg0: i32) -> (i32, i32) {
    %c0_i32 = arith.constant 0 : i32
    %c0_i32_0 = arith.constant 0 : i32
    return %arg0, %c0_i32 : i32, i32
  }
}

</mosaic_0001>

<bundles_post_ra>
// kernel: sequential_forward.1
= control target key start
LH: loop header
LB: loop body
LE: loop exit
PB: predicated region body
PF: predicated region fallthrough
CT: control target
= control target key end

     0   :  { %12 = vsyncpa [#allocation3], 0  ;;  %s1491_s0 = inlined_call_operand.vmem [shape: f32[8,256], index: 0, kind: input, shape index: {}]   ;;  %s1492_s1 = inlined_call_operand.vmem [shape: bf16[128,256], index: 1, kind: input, shape index: {}]   ;;  %s1493_s2 = inlined_call_operand.vmem [shape: f32[1,256], index: 2, kind: input, shape index: {}]   ;;  %s1494_s3 = inlined_call_operand.hbm [shape: bf16[128,128], index: 3, kind: input, shape index: {}]   ;;  %s1495_s4 = inlined_call_operand.vmem [shape: f32[1,128], index: 4, kind: input, shape index: {}]   ;;  %s1496_s5 = inlined_call_operand.hbm [shape: bf16[512,128], index: 5, kind: input, shape index: {}]   ;;  %s1497_s6 = inlined_call_operand.vmem [shape: f32[1,128], index: 6, kind: input, shape index: {}]   ;;  %s1498_s7 = inlined_call_operand.vmem [shape: f32[8,128], index: 7, kind: output, shape index: {}]  }
   0x1   :  { %13 = vsyncpa [#allocation5], 0  ;;  %s1183_s24 = smov [#allocation2]   ;;  %s1135_s28 = scalar_lea.hbm %s1494_s3, 1024 }
   0x2   :  { %s25_s25 = sshll.u32 %s1183_s24, 4  ;;  %p1136_p0 = scmp.ne.s32.totalorder %s1494_s3, %s1135_s28  ;;  %s26_s25 = int_to_ptr.vmem [resolvable:$true] %s25_s25 }
   0x3   :  { %p1139_p1 = scmp.lt.u32.totalorder %s1135_s28, %s1494_s3 }
   0x5   :  { %p1141_p2 = pnand %p1139_p1, %p1136_p0 }
   0x7   :  { %1144 = shalt.err (!%p1141_p2)
}
   0x8   :  { %s1145_s10 = scalar_lea.vmem %s26_s25, 1024  ;;  %p1150_p4 = scmp.lt.s32.totalorder %s26_s25, %s26_s25 }
   0x9   :  { %p1146_p3 = scmp.ne.s32.totalorder %s26_s25, %s1145_s10  ;;  %p1151_p5 = scmp.lt.s32.totalorder %s1145_s10, %s1145_s10 }
   0xb   :  { %p1152_p6 = por %p1151_p5, %p1150_p4 }
   0xd   :  { %p1153_p7 = pnand %p1152_p6, %p1146_p3 }
   0xf   :  { %1156 = shalt.err (!%p1153_p7)
}
  0x10   :  { %s1184_s11 = smov 64   ;;  %s1185_s12 = smov 4  }
  0x11   :  { %31 = dma.hbm_to_vmem [thread:$0]  %s1494_s3, 1024, %s26_s25, [#allocation3], %s1184_s11, %s1184_s11, %s1185_s12  }
  0x12   :  { %s1186_s15 = smov [#allocation4]   ;;  %s1157_s19 = scalar_lea.hbm %s1496_s5, 4096 }
  0x13   :  { %s39_s16 = sshll.u32 %s1186_s15, 4  ;;  %p1158_p8 = scmp.ne.s32.totalorder %s1496_s5, %s1157_s19  ;;  %s40_s16 = int_to_ptr.vmem [resolvable:$true] %s39_s16 }
  0x14   :  { %p1161_p9 = scmp.lt.u32.totalorder %s1157_s19, %s1496_s5 }
  0x16   :  { %p1163_p10 = pnand %p1161_p9, %p1158_p8 }
  0x18   :  { %1166 = shalt.err (!%p1163_p10)
}
  0x19   :  { %s1167_s24 = scalar_lea.vmem %s40_s16, 4096  ;;  %p1172_p12 = scmp.lt.s32.totalorder %s40_s16, %s40_s16 }
  0x1a   :  { %p1168_p11 = scmp.ne.s32.totalorder %s40_s16, %s1167_s24  ;;  %p1173_p13 = scmp.lt.s32.totalorder %s1167_s24, %s1167_s24 }
  0x1c   :  { %p1174_p0 = por %p1173_p13, %p1172_p12 }
  0x1e   :  { %p1175_p1 = pnand %p1174_p0, %p1168_p11 }
  0x20   :  { %1178 = shalt.err (!%p1175_p1)
}
  0x21   :  { %45 = dma.hbm_to_vmem [thread:$0]  %s1496_s5, 4096, %s40_s16, [#allocation5], %s1184_s11, %s1184_s11, %s1185_s12  }
  0x22   :  { %1179 = dma.done.wait [#allocation3], 1024  }
  0x23   :  { %1180 = vsyncadd [#allocation3], 4294966272 }
  0x24   :  { %1181 = dma.done.wait [#allocation5], 4096  }
  0x25   :  { %1182 = vsyncadd [#allocation5], 4294963200  ;;  %v1187_v0 = vmov 0   ;;  %v1188_v1 = vmov 0.0   ;;  %v1259_v2 = vld [vmem:[%s1492_s1 + $0x4] ss:$8 sps:$4 sm:$0xff]   ;;  %v159_v28 = vlaneseq }
  0x26   :  { %281 = vmatprep.mubr.bf16.mxu0 %v1187_v0  ;;  %984 = vmatprep.subr.bf16.mxu1 %v1188_v1  ;;  %v1264_v3 = vld [vmem:[%s1492_s1] ss:$8 sps:$4 sm:$0xff]   ;;  %v1270_v4 = vld [vmem:[%s1492_s1 + $0x14] ss:$8 sps:$4 sm:$0xff]   ;;  %v1276_v5 = vld [vmem:[%s1492_s1 + $0x10] ss:$8 sps:$4 sm:$0xff]  }
  0x27   :  { %249 = vmatprep.subr.bf16.mxu0 %v1259_v2  ;;  %v1282_v6 = vld [vmem:[%s1492_s1 + $0x24] ss:$8 sps:$4 sm:$0xff]   ;;  %v1288_v7 = vld [vmem:[%s1492_s1 + $0x20] ss:$8 sps:$4 sm:$0xff]   ;;  %v1294_v8 = vld [vmem:[%s1492_s1 + $0x34] ss:$8 sps:$4 sm:$0xff]  }
  0x28   :  { %250 = vmatpush1.bf16.msra.mxu0 %v1264_v3  ;;  %v1299_v9 = vld [vmem:[%s1492_s1 + $0x30] ss:$8 sps:$4 sm:$0xff]   ;;  %v1302_v10 = vld [vmem:[#allocation2] sm:$0xff]   ;;  %v1311_v12 = vld [vmem:[#allocation2 + $0x8] sm:$0xff]   ;;  %vm1189_vm0 = vmmov 0   ;;  %v160_v29 = vshrl.u32 %v159_v28, 7 }
  0x29   :  { %251 = vmatprep.subr.bf16.mxu0 %v1270_v4  ;;  %v1308_v11 = vld [vmem:[%s1492_s1 + $0x44] ss:$8 sps:$4 sm:$0xff]   ;;  %985 = vmatpush3.bf16.msra.mxu1 %v1302_v10  ;;  %v1318_v13 = vld [vmem:[%s1492_s1 + $0x40] ss:$8 sps:$4 sm:$0xff]   ;;  %v1324_v14 = vld [vmem:[%s1492_s1 + $0x54] ss:$8 sps:$4 sm:$0xff]  }
  0x2a   :  { %986 = vmatprep.subr.bf16.mxu1 %v1188_v1  ;;  %v1329_v15 = vld [vmem:[%s1492_s1 + $0x50] ss:$8 sps:$4 sm:$0xff]   ;;  %v1337_v17 = vld [vmem:[%s1492_s1 + $0x64] ss:$8 sps:$4 sm:$0xff]   ;;  %v1347_v19 = vld [vmem:[%s1492_s1 + $0x60] ss:$8 sps:$4 sm:$0xff]   ;;  %1000 = vmatprep.mubr.msk.bf16.mxu1 %vm1189_vm0, %v1188_v1 }
  0x2b   :  { %v1332_v16 = vld [vmem:[#allocation2 + $0x10] sm:$0xff]   ;;  %v1341_v18 = vld [vmem:[#allocation2 + $0x18] sm:$0xff]   ;;  %v1357_v21 = vld [vmem:[#allocation2 + $0x20] sm:$0xff]   ;;  %v161_v30 = vsub.s32 0, %v160_v29  ;;  %v165_v32 = vsub.s32 1, %v160_v29 }
  0x2c   :  { %252 = vmatpush1.bf16.msra.mxu0 %v1276_v5  ;;  %v1353_v20 = vld [vmem:[%s1492_s1 + $0x74] ss:$8 sps:$4 sm:$0xff]   ;;  %v1363_v22 = vld [vmem:[%s1492_s1 + $0x70] ss:$8 sps:$4 sm:$0xff]   ;;  %v55_v23 = vld [vmem:[%s1491_s0] sm:$0xff] }
  0x2d   :  { %253 = vmatprep.subr.bf16.mxu0 %v1282_v6  ;;  %987 = vmatpush3.bf16.msra.mxu1 %v1311_v12  ;;  %v1371_v24 = vld [vmem:[#allocation2 + $0x28] sm:$0xff]   ;;  %v57_v25 = vpack.c.bf16 %v55_v23, %v55_v23  ;;  %v1377_v26 = vld [vmem:[#allocation2 + $0x30] sm:$0xff]   ;;  %v1398_v27 = vld [vmem:[#allocation2 + $0x38] sm:$0xff]  }
  0x2e   :  { %988 = vmatprep.subr.bf16.mxu1 %v1188_v1  ;;  %v155_v31 = vld [vmem:[%s1493_s2] sm:$0x3]  ;;  %v56_v45 = vld [vmem:[%s1491_s0 + $0x8] sm:$0xff]  ;;  %v1115_v28 = vld [vmem:[#allocation4 + $0x70] sm:$0xff]  }
  0x2f   :  { %v1411_v33 = vrot.slane %v155_v31, %v161_v30  ;;  %v1413_v34 = vrot.slane %v155_v31, %v165_v32  ;;  %v58_v46 = vpack.c.bf16 %v56_v45, %v56_v45  ;;  %v1103_v47 = vld [vmem:[#allocation4 + $0x40] sm:$0xff]   ;;  %v1130_v29 = vld [vmem:[#allocation4 + $0xa8] sm:$0xff]   ;;  %v1116_v30 = vld [vmem:[#allocation4 + $0x30] sm:$0xff]  }
  0x30   :  { %254 = vmatpush1.bf16.msra.mxu0 %v1288_v7  ;;  %v1119_v48 = vld [vmem:[#allocation4 + $0xc0] sm:$0xff]   ;;  %v1117_v32 = vld [vmem:[#allocation4 + $0x78] sm:$0xff]  }
  0x31   :  { %255 = vmatprep.subr.bf16.mxu0 %v1294_v8  ;;  %989 = vmatpush3.bf16.msra.mxu1 %v1332_v16  ;;  %v1476_v57 = vld [vmem:[%s1495_s4] ss:$0 sm:$0xff] }
  0x32   :  { %990 = vmatprep.subr.bf16.mxu1 %v1188_v1  ;;  %v1112_v23 = vld [vmem:[#allocation4 + $0x20] sm:$0xff]  }
  0x34   :  { %256 = vmatpush1.bf16.msra.mxu0 %v1299_v9 }
  0x35   :  { %257 = vmatprep.subr.bf16.mxu0 %v1308_v11  ;;  %991 = vmatpush3.bf16.msra.mxu1 %v1341_v18 }
  0x36   :  { %992 = vmatprep.subr.bf16.mxu1 %v1188_v1 }
  0x38   :  { %258 = vmatpush1.bf16.msra.mxu0 %v1318_v13 }
  0x39   :  { %259 = vmatprep.subr.bf16.mxu0 %v1324_v14  ;;  %993 = vmatpush3.bf16.msra.mxu1 %v1357_v21 }
  0x3a   :  { %994 = vmatprep.subr.bf16.mxu1 %v1188_v1 }
  0x3c   :  { %260 = vmatpush1.bf16.msra.mxu0 %v1329_v15 }
  0x3d   :  { %261 = vmatprep.subr.bf16.mxu0 %v1337_v17  ;;  %995 = vmatpush3.bf16.msra.mxu1 %v1371_v24 }
  0x3e   :  { %996 = vmatprep.subr.bf16.mxu1 %v1188_v1 }
  0x40   :  { %262 = vmatpush1.bf16.msra.mxu0 %v1347_v19 }
  0x41   :  { %263 = vmatprep.subr.bf16.mxu0 %v1353_v20  ;;  %997 = vmatpush3.bf16.msra.mxu1 %v1377_v26 }
  0x42   :  { %998 = vmatprep.subr.bf16.mxu1 %v1188_v1 }
  0x44   :  { %264 = vmatpush1.bf16.msra.mxu0 %v1363_v22 }
  0x45   :  { %1004 = vmatprep.subr.bf16.mxu0 %v1188_v1  ;;  %999 = vmatpush3.bf16.msra.mxu1 %v1398_v27 }
  0x46   :  { %432 = vmatprep.subr.bf16.mxu1 %v1259_v2 }
  0x47   :  { %282 = vmatmul.mubr.bf16.vlgmr.msra.gmra.mrb[0].mxu0 %v57_v25  ;;  %v1128_v25 = vld [vmem:[#allocation4 + $0xa0] sm:$0xff]  }
  0x48   :  { %1005 = vmatpush3.bf16.msra.mxu0 %v1302_v10  ;;  %1020 = vmatprep.mubr.msk.bf16.mxu0 %vm1189_vm0, %v1188_v1 }
  0x49   :  { %1006 = vmatprep.subr.bf16.mxu0 %v1188_v1 }
  0x4c   :  { %1007 = vmatpush3.bf16.msra.mxu0 %v1311_v12 }
  0x4d   :  { %1008 = vmatprep.subr.bf16.mxu0 %v1188_v1 }
  0x50   :  { %1009 = vmatpush3.bf16.msra.mxu0 %v1332_v16 }
  0x51   :  { %1010 = vmatprep.subr.bf16.mxu0 %v1188_v1 }
  0x54   :  { %1011 = vmatpush3.bf16.msra.mxu0 %v1341_v18 }
  0x55   :  { %1012 = vmatprep.subr.bf16.mxu0 %v1188_v1 }
  0x58   :  { %1013 = vmatpush3.bf16.msra.mxu0 %v1357_v21 }
  0x59   :  { %1014 = vmatprep.subr.bf16.mxu0 %v1188_v1 }
  0x5c   :  { %1015 = vmatpush3.bf16.msra.mxu0 %v1371_v24 }
  0x5d   :  { %1016 = vmatprep.subr.bf16.mxu0 %v1188_v1 }
  0x60   :  { %1017 = vmatpush3.bf16.msra.mxu0 %v1377_v26 }
  0x61   :  { %1018 = vmatprep.subr.bf16.mxu0 %v1188_v1 }
  0x64   :  { %1019 = vmatpush3.bf16.msra.mxu0 %v1398_v27 }
  0x65   :  { %1024 = vmatprep.subr.bf16.mxu0 %v1188_v1 }
 0x11a   :  { %v283_v35 = vpop.f32.mrb[0].mxu0 }
 0x11b   :  { %v284_v36 = vadd.f32 %v283_v35, %v1411_v33  ;;  %v285_v37 = vpop.f32.mrb[1].mxu0 }
 0x11c   :  { %v286_v38 = vadd.f32 %v285_v37, %v1413_v34  ;;  %v287_v39 = vpop.f32.mrb[2].mxu0  ;;  %v1132_v37 = vld [vmem:[#allocation4 + $0xb0] sm:$0xff]  }
 0x11d   :  { %v290_v40 = vmax.f32 %v284_v36, 0.0  ;;  %v288_v41 = vpop.f32.mrb[3].mxu0  ;;  %v1131_v36 = vld [vmem:[#allocation4 + $0xf0] sm:$0xff]   ;;  %v1134_v39 = vld [vmem:[#allocation4 + $0xb8] sm:$0xff]  }
 0x11e   :  { %v291_v42 = vmax.f32 %v286_v38, 0.0  ;;  %v1133_v38 = vld [vmem:[#allocation4 + $0xf8] sm:$0xff]  }
 0x11f   :  { %v292_v43 = vpack.c.bf16 %v290_v40, %v290_v40 }
 0x120   :  { %v293_v44 = vpack.c.bf16 %v291_v42, %v291_v42 }
 0x121   :  { %1001 = vmatmul.mubr.bf16.vlgmr.msra.gmra.mrb[0].mxu1 %v292_v43 }
 0x122   :  { %433 = vmatpush1.bf16.msra.mxu1 %v1264_v3  ;;  %1021 = vmatmul.mubr.bf16.vlgmr.msra.gmra.mrb[4].mxu0 %v293_v44 }
 0x123   :  { %434 = vmatprep.subr.bf16.mxu1 %v1270_v4  ;;  %464 = vmatprep.mubr.bf16.mxu1 %v1187_v0  ;;  %v1104_v4 = vld [vmem:[#allocation4] sm:$0xff]  }
 0x124   :  { %1025 = vmatpush3.bf16.msra.mxu0 %v1302_v10  ;;  %1040 = vmatprep.mubr.msk.bf16.mxu0 %vm1189_vm0, %v1188_v1 }
 0x125   :  { %1026 = vmatprep.subr.bf16.mxu0 %v1188_v1 }
 0x126   :  { %435 = vmatpush1.bf16.msra.mxu1 %v1276_v5 }
 0x127   :  { %436 = vmatprep.subr.bf16.mxu1 %v1282_v6  ;;  %v1105_v6 = vld [vmem:[#allocation4 + $0x48] sm:$0xff]  }
 0x128   :  { %1027 = vmatpush3.bf16.msra.mxu0 %v1311_v12 }
 0x129   :  { %1028 = vmatprep.subr.bf16.mxu0 %v1188_v1 }
 0x12a   :  { %437 = vmatpush1.bf16.msra.mxu1 %v1288_v7 }
 0x12b   :  { %438 = vmatprep.subr.bf16.mxu1 %v1294_v8  ;;  %v1120_v8 = vld [vmem:[#allocation4 + $0x80] sm:$0xff]  }
 0x12c   :  { %1029 = vmatpush3.bf16.msra.mxu0 %v1332_v16 }
 0x12d   :  { %1030 = vmatprep.subr.bf16.mxu0 %v1188_v1 }
 0x12e   :  { %439 = vmatpush1.bf16.msra.mxu1 %v1299_v9 }
 0x12f   :  { %440 = vmatprep.subr.bf16.mxu1 %v1308_v11  ;;  %v1106_v11 = vld [vmem:[#allocation4 + $0x8] sm:$0xff]  }
 0x130   :  { %1031 = vmatpush3.bf16.msra.mxu0 %v1341_v18 }
 0x131   :  { %1032 = vmatprep.subr.bf16.mxu0 %v1188_v1 }
 0x132   :  { %441 = vmatpush1.bf16.msra.mxu1 %v1318_v13  ;;  %v1122_v13 = vld [vmem:[#allocation4 + $0x88] sm:$0xff]  }
 0x133   :  { %442 = vmatprep.subr.bf16.mxu1 %v1324_v14  ;;  %v1123_v14 = vld [vmem:[#allocation4 + $0xd0] sm:$0xff]  }
 0x134   :  { %1033 = vmatpush3.bf16.msra.mxu0 %v1357_v21 }
 0x135   :  { %1034 = vmatprep.subr.bf16.mxu0 %v1188_v1 }
 0x136   :  { %443 = vmatpush1.bf16.msra.mxu1 %v1329_v15  ;;  %v1108_v15 = vld [vmem:[#allocation4 + $0x10] sm:$0xff]  }
 0x137   :  { %444 = vmatprep.subr.bf16.mxu1 %v1337_v17  ;;  %v1124_v17 = vld [vmem:[#allocation4 + $0x90] sm:$0xff]  }
 0x138   :  { %1035 = vmatpush3.bf16.msra.mxu0 %v1371_v24 }
 0x139   :  { %1036 = vmatprep.subr.bf16.mxu0 %v1188_v1 }
 0x13a   :  { %445 = vmatpush1.bf16.msra.mxu1 %v1347_v19  ;;  %v1110_v19 = vld [vmem:[#allocation4 + $0x18] sm:$0xff]  }
 0x13b   :  { %446 = vmatprep.subr.bf16.mxu1 %v1353_v20  ;;  %v1111_v20 = vld [vmem:[#allocation4 + $0x60] sm:$0xff]  }
 0x13c   :  { %1037 = vmatpush3.bf16.msra.mxu0 %v1377_v26 }
 0x13d   :  { %1038 = vmatprep.subr.bf16.mxu0 %v1188_v1 }
 0x13e   :  { %447 = vmatpush1.bf16.msra.mxu1 %v1363_v22  ;;  %v1127_v22 = vld [vmem:[#allocation4 + $0xe0] sm:$0xff]  }
 0x13f   :  { %1044 = vmatprep.subr.bf16.mxu1 %v1188_v1 }
 0x140   :  { %1039 = vmatpush3.bf16.msra.mxu0 %v1398_v27 }
 0x141   :  { %465 = vmatmul.mubr.bf16.vlgmr.msra.gmra.mrb[4].mxu1 %v58_v46  ;;  %940 = vmatprep.subr.bf16.mxu0 %v1103_v47 }
 0x142   :  { %1045 = vmatpush3.bf16.msra.mxu1 %v1302_v10  ;;  %1060 = vmatprep.mubr.msk.bf16.mxu1 %vm1189_vm0, %v1188_v1  ;;  %v1121_v10 = vld [vmem:[#allocation4 + $0xc8] sm:$0xff]  }
 0x143   :  { %1046 = vmatprep.subr.bf16.mxu1 %v1188_v1 }
 0x146   :  { %1047 = vmatpush3.bf16.msra.mxu1 %v1311_v12  ;;  %v1107_v12 = vld [vmem:[#allocation4 + $0x50] sm:$0xff]  }
 0x147   :  { %1048 = vmatprep.subr.bf16.mxu1 %v1188_v1 }
 0x14a   :  { %1049 = vmatpush3.bf16.msra.mxu1 %v1332_v16  ;;  %v1109_v16 = vld [vmem:[#allocation4 + $0x58] sm:$0xff]  }
 0x14b   :  { %1050 = vmatprep.subr.bf16.mxu1 %v1188_v1 }
 0x14e   :  { %1051 = vmatpush3.bf16.msra.mxu1 %v1341_v18  ;;  %v1125_v18 = vld [vmem:[#allocation4 + $0xd8] sm:$0xff]  }
 0x14f   :  { %1052 = vmatprep.subr.bf16.mxu1 %v1188_v1 }
 0x152   :  { %1053 = vmatpush3.bf16.msra.mxu1 %v1357_v21  ;;  %v1126_v21 = vld [vmem:[#allocation4 + $0x98] sm:$0xff]  }
 0x153   :  { %1054 = vmatprep.subr.bf16.mxu1 %v1188_v1 }
 0x156   :  { %1055 = vmatpush3.bf16.msra.mxu1 %v1371_v24  ;;  %v1113_v24 = vld [vmem:[#allocation4 + $0x68] sm:$0xff]  }
 0x157   :  { %1056 = vmatprep.subr.bf16.mxu1 %v1188_v1 }
 0x15a   :  { %1057 = vmatpush3.bf16.msra.mxu1 %v1377_v26  ;;  %v1129_v26 = vld [vmem:[#allocation4 + $0xe8] sm:$0xff]  }
 0x15b   :  { %1058 = vmatprep.subr.bf16.mxu1 %v1188_v1 }
 0x15e   :  { %1059 = vmatpush3.bf16.msra.mxu1 %v1398_v27  ;;  %v1114_v27 = vld [vmem:[#allocation4 + $0x28] sm:$0xff]  }
 0x15f   :  { %962 = vmatprep.subr.bf16.mxu1 %v1119_v48 }
 0x1f4   :  { %v1471_v49 = vpop.f32.mrb[0].mxu1 }
 0x1f5   :  { %v1002_v50 = vpop.f32.mrb[1].mxu1  ;;  %v424_v51 = vpop.f32.mrb[4].mxu0  ;;  %v383_v31 = vadd.f32 %v1476_v57, %v1471_v49 }
 0x1f6   :  { %v385_v52 = vpop.f32.mrb[2].mxu1  ;;  %v1022_v53 = vpop.f32.mrb[5].mxu0  ;;  %v425_v58 = vadd.f32 %v1476_v57, %v424_v51 }
 0x1f7   :  { %v1003_v54 = vpop.f32.mrb[3].mxu1  ;;  %v427_v55 = vpop.f32.mrb[6].mxu0 }
 0x1f8   :  { %v1023_v56 = vpop.f32.mrb[7].mxu0  ;;  %v430_v0 = vmax.f32 %v425_v58, 0.0 }
 0x1fa   :  { %v431_v9 = vpack.c.bf16 %v430_v0, %v430_v0 }
 0x214   :  { %v466_v59 = vpop.f32.mrb[4].mxu1 }
 0x215   :  { %v467_v60 = vadd.f32 %v466_v59, %v1411_v33  ;;  %v468_v61 = vpop.f32.mrb[5].mxu1  ;;  %v1118_v33 = vld [vmem:[#allocation4 + $0x38] sm:$0xff]  }
 0x216   :  { %v469_v62 = vadd.f32 %v468_v61, %v1413_v34  ;;  %v470_v63 = vpop.f32.mrb[6].mxu1  ;;  %v388_v34 = vmax.f32 %v383_v31, 0.0 }
 0x217   :  { %v473_v1 = vmax.f32 %v467_v60, 0.0  ;;  %v471_v2 = vpop.f32.mrb[7].mxu1 }
 0x218   :  { %v474_v3 = vmax.f32 %v469_v62, 0.0  ;;  %v389_v35 = vpack.c.bf16 %v388_v34, %v388_v34 }
 0x219   :  { %v475_v5 = vpack.c.bf16 %v473_v1, %v473_v1 }
 0x21a   :  { %v476_v7 = vpack.c.bf16 %v474_v3, %v474_v3 }
 0x21b   :  { %1041 = vmatmul.mubr.bf16.vlgmr.msra.gmra.mrb[8].mxu0 %v475_v5 }
 0x21c   :  { %941 = vmatpush3.bf16.msra.mxu0 %v1104_v4  ;;  %1061 = vmatmul.mubr.bf16.vlgmr.msra.gmra.mrb[8].mxu1 %v476_v7 }
 0x21d   :  { %791 = vmatprep.mubr.bf16.mxu0 %v431_v9  ;;  %942 = vmatprep.subr.bf16.mxu0 %v1105_v6 }
 0x21e   :  { %963 = vmatpush3.bf16.msra.mxu1 %v1120_v8 }
 0x21f   :  { %964 = vmatprep.subr.bf16.mxu1 %v1121_v10 }
 0x220   :  { %943 = vmatpush3.bf16.msra.mxu0 %v1106_v11 }
 0x221   :  { %944 = vmatprep.subr.bf16.mxu0 %v1107_v12 }
 0x222   :  { %965 = vmatpush3.bf16.msra.mxu1 %v1122_v13 }
 0x223   :  { %966 = vmatprep.subr.bf16.mxu1 %v1123_v14 }
 0x224   :  { %945 = vmatpush3.bf16.msra.mxu0 %v1108_v15 }
 0x225   :  { %946 = vmatprep.subr.bf16.mxu0 %v1109_v16 }
 0x226   :  { %967 = vmatpush3.bf16.msra.mxu1 %v1124_v17 }
 0x227   :  { %968 = vmatprep.subr.bf16.mxu1 %v1125_v18 }
 0x228   :  { %947 = vmatpush3.bf16.msra.mxu0 %v1110_v19 }
 0x229   :  { %948 = vmatprep.subr.bf16.mxu0 %v1111_v20 }
 0x22a   :  { %969 = vmatpush3.bf16.msra.mxu1 %v1126_v21 }
 0x22b   :  { %970 = vmatprep.subr.bf16.mxu1 %v1127_v22 }
 0x22c   :  { %949 = vmatpush3.bf16.msra.mxu0 %v1112_v23 }
 0x22d   :  { %950 = vmatprep.subr.bf16.mxu0 %v1113_v24 }
 0x22e   :  { %971 = vmatpush3.bf16.msra.mxu1 %v1128_v25 }
 0x22f   :  { %972 = vmatprep.subr.bf16.mxu1 %v1129_v26 }
 0x230   :  { %951 = vmatpush3.bf16.msra.mxu0 %v1114_v27 }
 0x231   :  { %952 = vmatprep.subr.bf16.mxu0 %v1115_v28 }
 0x232   :  { %973 = vmatpush3.bf16.msra.mxu1 %v1130_v29 }
 0x233   :  { %974 = vmatprep.subr.bf16.mxu1 %v1131_v36 }
 0x234   :  { %953 = vmatpush3.bf16.msra.mxu0 %v1116_v30 }
 0x235   :  { %954 = vmatprep.subr.bf16.mxu0 %v1117_v32 }
 0x236   :  { %975 = vmatpush3.bf16.msra.mxu1 %v1132_v37 }
 0x237   :  { %976 = vmatprep.subr.bf16.mxu1 %v1133_v38 }
 0x238   :  { %955 = vmatpush3.bf16.msra.mxu0 %v1118_v33 }
 0x23a   :  { %977 = vmatpush3.bf16.msra.mxu1 %v1134_v39 }
 0x23b   :  { %792 = vmatmul.mubr.bf16.vlgmr.msra.gmra.mrb[12].mxu0 %v389_v35 }
 0x2ee   :  { %v511_v40 = vpop.f32.mrb[8].mxu0 }
 0x2ef   :  { %v512_v41 = vadd.f32 %v1476_v57, %v511_v40  ;;  %v1042_v42 = vpop.f32.mrb[9].mxu0  ;;  %v553_v43 = vpop.f32.mrb[8].mxu1 }
 0x2f0   :  { %v554_v44 = vadd.f32 %v1476_v57, %v553_v43  ;;  %v514_v45 = vpop.f32.mrb[10].mxu0  ;;  %v1062_v46 = vpop.f32.mrb[9].mxu1  ;;  %v871_v57 = vld [vmem:[%s1497_s6] ss:$0 sm:$0xff] }
 0x2f1   :  { %v517_v47 = vmax.f32 %v512_v41, 0.0  ;;  %v1043_v48 = vpop.f32.mrb[11].mxu0  ;;  %v556_v49 = vpop.f32.mrb[10].mxu1 }
 0x2f2   :  { %v559_v50 = vmax.f32 %v554_v44, 0.0  ;;  %v1063_v51 = vpop.f32.mrb[11].mxu1 }
 0x2f3   :  { %v518_v53 = vpack.c.bf16 %v517_v47, %v517_v47 }
 0x2f4   :  { %v560_v52 = vpack.c.bf16 %v559_v50, %v559_v50 }
 0x2f6   :  { %831 = vmatprep.mubr.bf16.mxu1 %v560_v52 }
 0x2f7   :  { %832 = vmatmul.mubr.bf16.vlgmr.msra.gmra.mrb[12].mxu1 %v518_v53 }
 0x30e   :  { %v956_v54 = vpop.f32.mrb[12].mxu0 }
 0x30f   :  { %v957_v55 = vpop.f32.mrb[13].mxu0 }
 0x310   :  { %v958_v56 = vadd.f32 %v957_v55, %v956_v54  ;;  %v959_v58 = vpop.f32.mrb[14].mxu0 }
 0x311   :  { %v960_v59 = vpop.f32.mrb[15].mxu0 }
 0x312   :  { %v794_v62 = vadd.f32 %v958_v56, %v871_v57 }
 0x3ca   :  { %v978_v60 = vpop.f32.mrb[12].mxu1 }
 0x3cb   :  { %v979_v61 = vpop.f32.mrb[13].mxu1 }
 0x3cc   :  { %v980_v63 = vadd.f32 %v979_v61, %v978_v60  ;;  %v981_v0 = vpop.f32.mrb[14].mxu1 }
 0x3cd   :  { %v982_v1 = vpop.f32.mrb[15].mxu1 }
 0x3ce   :  { %v834_v2 = vadd.f32 %v980_v63, %v794_v62 }
 0x3d0   :  { %839 = vst [vmem:[%s1498_s7] sm:$0xff] %v834_v2 }
 0x3d1   :  { %844 = vsyncpa [#allocation3], 1 }
 0x3d2   :  { %845 = vsyncpa [#allocation5], 1 }

</bundles_post_ra>
